<compile_context>
chip_gen: v7x
topology: tpu7x:2x2x1
jax: 0.10.0
libtpu: 0.0.40
codegen_flags: <defaults>
</compile_context>

<pallas_src>
import functools

import jax
import jax.numpy as jnp
from jax.experimental import pallas as pl
from jax.experimental.pallas import tpu as pltpu

_LANE_CANDIDATES = (512, 384, 256, 128)   # lane-dense widths (multiples of 128)
_TARGET_BLOCK_BYTES = 4 * 1024 * 1024     # ~4 MiB per input block
_TINY = float(jnp.finfo(jnp.float32).tiny)


def _round_up(x, m):
    return (x + m - 1) // m * m


def _num_tensorcores():
    """Conservative TensorCores-per-chip detection: 2 on v7x, else 1."""
    try:
        kind = jax.devices()[0].device_kind.lower()
    except Exception:
        return 1
    return 2 if ("v7" in kind or "7x" in kind) else 1


def _plan_rows(rows, target_rows, ncores):
    """Static planning of the row dimension.

    Returns (ncores_eff, inner_blocks, tile_rows) with
      * tile_rows % 8 == 0 (or tile_rows == rows when rows < 8),
      * tile_rows <= rows, so every block starts inside the array (the last
        block may be partial; it is masked in-kernel, DMA is clipped),
      * ncores_eff * inner_blocks == cdiv(rows, tile_rows)  (no all-padding
        blocks, minimal wasted compute on the ragged tail).
    """
    if rows < 8:
        return 1, 1, rows
    max_tile = (rows // 8) * 8
    tile_cap = min(target_rows, max_tile)

    def balance(n_blocks):
        return min(_round_up(pl.cdiv(rows, n_blocks), 8), tile_cap)

    if ncores > 1 and rows >= ncores * tile_cap:
        # Enough work for a per-core split: find a tile (multiple of 8) whose
        # induced block count is a multiple of ncores.
        tile = balance(ncores * pl.cdiv(rows, ncores * tile_cap))
        for _ in range(128):              # bounded search
            blocks = pl.cdiv(rows, tile)
            if blocks % ncores == 0:
                return ncores, blocks // ncores, tile
            tile -= 8
            if tile < 8:
                break
    blocks = pl.cdiv(rows, tile_cap)
    tile = balance(blocks)
    return 1, pl.cdiv(rows, tile), tile


def _accumulate(labels_ref, preds_ref, accs, *, n_groups, valid_rows,
                acc_rows, lane, unroll):
    """Stream n_groups (acc_rows, lane) slabs into register-carried partial
    sums, then fold them once into the VMEM accumulators.  Rows >= valid_rows
    (garbage from the clipped DMA of a ragged boundary block) are masked to
    zero *before* any arithmetic, so NaN/Inf garbage cannot leak in."""
    sq_acc, l_acc, l2_acc, sm_acc = accs
    need_mask = valid_rows < n_groups * acc_rows
    row_iota = (jax.lax.broadcasted_iota(jnp.int32, (acc_rows, lane), 0)
                if need_mask else None)

    def body(g, carry):
        c_sq, c_l, c_l2, c_sm = carry
        r0 = pl.multiple_of(g * acc_rows, acc_rows)
        l = labels_ref[pl.ds(r0, acc_rows), :].astype(jnp.float32)
        p = preds_ref[pl.ds(r0, acc_rows), :].astype(jnp.float32)
        if need_mask:
            valid = (row_iota + g * acc_rows) < valid_rows
            l = jnp.where(valid, l, 0.0)
            p = jnp.where(valid, p, 0.0)
        diff = p - l
        c_sq = c_sq + diff * diff                # sum (p-l)^2
        c_l = c_l + l                            # sum l
        c_l2 = c_l2 + l * l                      # sum l^2
        denom = jnp.abs(p) + jnp.abs(l)
        safe = jnp.maximum(denom, _TINY)         # zero tail -> 0/_TINY == 0
        r = pl.reciprocal(safe, approx=True)     # EUP slot
        r = r * (2.0 - safe * r)                 # one Newton step -> ~f32 exact
        c_sm = c_sm + jnp.abs(diff) * r          # sum |p-l|/(|p|+|l|)
        return c_sq, c_l, c_l2, c_sm

    zeros = jnp.zeros((acc_rows, lane), jnp.float32)
    u = max(1, min(unroll, n_groups))
    c_sq, c_l, c_l2, c_sm = jax.lax.fori_loop(
        0, n_groups, body, (zeros, zeros, zeros, zeros), unroll=u)
    sq_acc[...] += c_sq
    l_acc[...] += c_l
    l2_acc[...] += c_l2
    sm_acc[...] += c_sm


def _mixloss_kernel(labels_ref, preds_ref, out_ref,
                    sq_acc, l_acc, l2_acc, sm_acc, *,
                    lane, tile_rows, acc_rows, inner_blocks, blocks_total,
                    rows, unroll):
    i = pl.program_id(1)

    @pl.when(i == 0)
    def _init():
        sq_acc[...] = jnp.zeros_like(sq_acc)
        l_acc[...] = jnp.zeros_like(l_acc)
        l2_acc[...] = jnp.zeros_like(l2_acc)
        sm_acc[...] = jnp.zeros_like(sm_acc)

    accs = (sq_acc, l_acc, l2_acc, sm_acc)
    n_groups_full = tile_rows // acc_rows
    last_valid = rows - (blocks_total - 1) * tile_rows          # static int
    n_groups_last = pl.cdiv(last_valid, acc_rows)
    acc = functools.partial(_accumulate, labels_ref, preds_ref, accs,
                            acc_rows=acc_rows, lane=lane, unroll=unroll)

    if last_valid == tile_rows:
        # All blocks are full: one clean, unmasked path.
        acc(n_groups=n_groups_full, valid_rows=tile_rows)
    else:
        flat = pl.program_id(0) * inner_blocks + i
        is_last = flat == blocks_total - 1

        @pl.when(flat != blocks_total - 1)
        def _full_block():
            acc(n_groups=n_groups_full, valid_rows=tile_rows)

        @pl.when(is_last)
        def _partial_block():
            acc(n_groups=n_groups_last, valid_rows=last_valid)

    @pl.when(i == inner_blocks - 1)
    def _finalize():
        # Single cross-lane/sublane reduction per core, epilogue only.
        s_sq = jnp.sum(sq_acc[...])
        s_l = jnp.sum(l_acc[...])
        s_l2 = jnp.sum(l2_acc[...])
        s_sm = jnp.sum(sm_acc[...])
        lane_idx = jax.lax.broadcasted_iota(jnp.int32, (8, 128), 1)
        out_ref[...] = (jnp.where(lane_idx == 0, s_sq, 0.0)
                        + jnp.where(lane_idx == 1, s_l, 0.0)
                        + jnp.where(lane_idx == 2, s_l2, 0.0)
                        + jnp.where(lane_idx == 3, s_sm, 0.0))


def mix_loss(labels, preds, *, num_cores=None):
    """Pallas MixLoss.  labels/preds: same shape; first dim is `len(preds)`."""
    assert labels.shape == preds.shape and labels.ndim >= 1
    n_first = preds.shape[0]
    total = 1
    for d in labels.shape:
        total *= d

    # Lane width: largest multiple of 128 dividing the element count, so the
    # 2-D view is a free reshape (no pad, no extra HBM traffic).
    lane = None
    for cand in _LANE_CANDIDATES:
        if total % cand == 0:
            lane = cand
            break

    l_flat = jnp.reshape(labels, (-1,))
    p_flat = jnp.reshape(preds, (-1,))
    if lane is None:
        # TODO(synk): element counts that are not a multiple of 128 still take
        # a small pad (materializes a padded copy); fold the <128-element tail
        # into the kernel (or use allow_input_fusion) to remove this too.
        lane = 128
        padded_total = _round_up(total, lane)
        l_flat = jnp.pad(l_flat, (0, padded_total - total))
        p_flat = jnp.pad(p_flat, (0, padded_total - total))
    else:
        padded_total = total

    rows = padded_total // lane
    itemsize = jnp.dtype(labels.dtype).itemsize
    target_rows = max(8, (_TARGET_BLOCK_BYTES // (lane * itemsize)) // 8 * 8)

    ncores = _num_tensorcores() if num_cores is None else int(num_cores)
    ncores_eff, inner_blocks, tile_rows = _plan_rows(rows, target_rows, ncores)
    blocks_total = ncores_eff * inner_blocks
    acc_rows = 8 if tile_rows >= 8 else tile_rows

    l2d = l_flat.reshape(rows, lane)
    p2d = p_flat.reshape(rows, lane)

    kernel = functools.partial(
        _mixloss_kernel, lane=lane, tile_rows=tile_rows, acc_rows=acc_rows,
        inner_blocks=inner_blocks, blocks_total=blocks_total, rows=rows,
        unroll=2)
    in_map = lambda c, i: (c * inner_blocks + i, 0)

    if ncores_eff > 1:
        dim_sem = (pltpu.CORE_PARALLEL, pltpu.ARBITRARY)   # real 2-TC split (v7x)
    else:
        dim_sem = ("arbitrary", "arbitrary")

    partials = pl.pallas_call(
        kernel,
        out_shape=jax.ShapeDtypeStruct((ncores_eff * 8, 128), jnp.float32),
        grid_spec=pltpu.PrefetchScalarGridSpec(
            num_scalar_prefetch=0,
            grid=(ncores_eff, inner_blocks),
            in_specs=[
                pl.BlockSpec((tile_rows, lane), in_map),
                pl.BlockSpec((tile_rows, lane), in_map),
            ],
            out_specs=pl.BlockSpec((8, 128), lambda c, i: (c, 0)),
            scratch_shapes=[pltpu.VMEM((acc_rows, lane), jnp.float32)] * 4,
        ),
        compiler_params=pltpu.CompilerParams(
            dimension_semantics=dim_sem,
            vmem_limit_bytes=32 * 1024 * 1024),
    )(l2d, p2d)

    parts = partials.reshape(ncores_eff, 8, 128)[:, 0, :4]     # (ncores, 4)
    sums = jnp.sum(parts, axis=0)
    sum_sq, sum_l, sum_l2, sum_sm = sums[0], sums[1], sums[2], sums[3]
    # sum((l - mean(l))^2) == sum(l^2) - (sum l)^2 / total  (real total)
    centered = sum_l2 - (sum_l * sum_l) / jnp.float32(total)
    r2 = sum_sq / centered
    smape = 2.0 * sum_sm / jnp.float32(n_first)
    return r2 + smape


def mix_loss_ref(labels, preds):
    """Pure-JAX reference, mirrors the PyTorch module exactly."""
    labels = jnp.asarray(labels, jnp.float32)
    preds = jnp.asarray(preds, jnp.float32)
    r2loss = jnp.sum((preds - labels) ** 2) / jnp.sum((labels - labels.mean()) ** 2)
    smapeloss = (1.0 / preds.shape[0]) * jnp.sum(
        2.0 * jnp.abs(preds - labels) / (jnp.abs(preds) + jnp.abs(labels)))
    return smapeloss + r2loss


if __name__ == "__main__":
    key = jax.random.PRNGKey(0)
    k_l, k_p = jax.random.split(key)

    # Case 1: batch of 8 predictions, 96 features (768 elements -> lane=384,
    # single full block, no padding, no masking).
    labels = jax.random.normal(k_l, (8, 96), dtype=jnp.float32)
    preds = jax.random.normal(k_p, (8, 96), dtype=jnp.float32)
    loss = mix_loss(labels, preds)
    jax.block_until_ready(loss)
    ref = mix_loss_ref(labels, preds)
    assert jnp.allclose(loss, ref, rtol=1e-4, atol=1e-4), (loss, ref)

    # Case 2: 48 x 96 (4608 elements -> lane=512, 9 rows, ragged last block)
    # exercises the in-kernel masked-tail path (no wrapper pad).
    k_l2, k_p2 = jax.random.split(k_p)
    labels2 = jax.random.normal(k_l2, (48, 96), dtype=jnp.float32)
    preds2 = jax.random.normal(k_p2, (48, 96), dtype=jnp.float32)
    loss2 = mix_loss(labels2, preds2)
    jax.block_until_ready(loss2)
    ref2 = mix_loss_ref(labels2, preds2)
    assert jnp.allclose(loss2, ref2, rtol=1e-4, atol=1e-4), (loss2, ref2)

    print("KERNEL_OK")
</pallas_src>

<mosaic_0001>
module attributes {stable_mosaic.version = 11 : i64} {
  func.func @_mixloss_kernel(%arg0: i32, %arg1: i32, %arg2: memref<2x384xf32, #tpu.memory_space<vmem>>, %arg3: memref<2x384xf32, #tpu.memory_space<vmem>>, %arg4: memref<8x128xf32, #tpu.memory_space<vmem>>, %arg5: memref<2x384xf32, #tpu.memory_space<vmem>>, %arg6: memref<2x384xf32, #tpu.memory_space<vmem>>, %arg7: memref<2x384xf32, #tpu.memory_space<vmem>>, %arg8: memref<2x384xf32, #tpu.memory_space<vmem>>) attributes {dimension_semantics = [#tpu.dimension_semantics<arbitrary>, #tpu.dimension_semantics<arbitrary>], iteration_bounds = array<i64: 1, 1>, scalar_prefetch = 0 : i64, scratch_operands = 4 : i64, tpu.core_type = #tpu.core_type<tc>, window_params = [{transform_indices = @transform_0, window_bounds = array<i64: 2, 384>}, {transform_indices = @transform_1, window_bounds = array<i64: 2, 384>}, {transform_indices = @transform_2, window_bounds = array<i64: 8, 128>}]} {
    %c0_i32 = arith.constant 0 : i32
    %0 = arith.cmpi eq, %arg1, %c0_i32 : i32
    %1 = arith.extui %0 : i1 to i32
    %c0_i32_0 = arith.constant 0 : i32
    %2 = arith.cmpi ne, %1, %c0_i32_0 : i32
    scf.if %2 {
      %cst_23 = arith.constant 0.000000e+00 : f32
      %44 = vector.broadcast %cst_23 : f32 to vector<2x384xf32>
      %c0_24 = arith.constant 0 : index
      %c0_25 = arith.constant 0 : index
      %45 = vector.load %arg5[%c0_24, %c0_25] : memref<2x384xf32, #tpu.memory_space<vmem>>, vector<2x384xf32>
      tpu.vector_store %arg5[%c0_24, %c0_25], %44 {strides = array<i32>} : memref<2x384xf32, #tpu.memory_space<vmem>>, vector<2x384xf32>,
      %cst_26 = arith.constant 0.000000e+00 : f32
      %46 = vector.broadcast %cst_26 : f32 to vector<2x384xf32>
      %c0_27 = arith.constant 0 : index
      %c0_28 = arith.constant 0 : index
      %47 = vector.load %arg6[%c0_27, %c0_28] : memref<2x384xf32, #tpu.memory_space<vmem>>, vector<2x384xf32>
      tpu.vector_store %arg6[%c0_27, %c0_28], %46 {strides = array<i32>} : memref<2x384xf32, #tpu.memory_space<vmem>>, vector<2x384xf32>,
      %cst_29 = arith.constant 0.000000e+00 : f32
      %48 = vector.broadcast %cst_29 : f32 to vector<2x384xf32>
      %c0_30 = arith.constant 0 : index
      %c0_31 = arith.constant 0 : index
      %49 = vector.load %arg7[%c0_30, %c0_31] : memref<2x384xf32, #tpu.memory_space<vmem>>, vector<2x384xf32>
      tpu.vector_store %arg7[%c0_30, %c0_31], %48 {strides = array<i32>} : memref<2x384xf32, #tpu.memory_space<vmem>>, vector<2x384xf32>,
      %cst_32 = arith.constant 0.000000e+00 : f32
      %50 = vector.broadcast %cst_32 : f32 to vector<2x384xf32>
      %c0_33 = arith.constant 0 : index
      %c0_34 = arith.constant 0 : index
      %51 = vector.load %arg8[%c0_33, %c0_34] : memref<2x384xf32, #tpu.memory_space<vmem>>, vector<2x384xf32>
      tpu.vector_store %arg8[%c0_33, %c0_34], %50 {strides = array<i32>} : memref<2x384xf32, #tpu.memory_space<vmem>>, vector<2x384xf32>,
    } else {
    }
    %cst = arith.constant 0.000000e+00 : f32
    %3 = vector.broadcast %cst : f32 to vector<2x384xf32>
    %c0_i32_1 = arith.constant 0 : i32
    %c2_i32 = arith.constant 2 : i32
    %4 = arith.muli %c0_i32_1, %c2_i32 : i32
    %5 = tpu.assume_multiple %4, 2 : i32
    %6 = arith.index_cast %5 : i32 to index
    %c0 = arith.constant 0 : index
    %7 = vector.load %arg2[%6, %c0] : memref<2x384xf32, #tpu.memory_space<vmem>>, vector<2x384xf32>
    %8 = arith.index_cast %5 : i32 to index
    %c0_2 = arith.constant 0 : index
    %9 = vector.load %arg3[%8, %c0_2] : memref<2x384xf32, #tpu.memory_space<vmem>>, vector<2x384xf32>
    %10 = arith.subf %9, %7 : vector<2x384xf32>
    %11 = arith.mulf %10, %10 : vector<2x384xf32>
    %12 = arith.addf %3, %11 : vector<2x384xf32>
    %13 = arith.addf %3, %7 : vector<2x384xf32>
    %14 = arith.mulf %7, %7 : vector<2x384xf32>
    %15 = arith.addf %3, %14 : vector<2x384xf32>
    %16 = math.absf %9 : vector<2x384xf32>
    %17 = math.absf %7 : vector<2x384xf32>
    %18 = arith.addf %16, %17 : vector<2x384xf32>
    %cst_3 = arith.constant 1.17549435E-38 : f32
    %19 = vector.broadcast %cst_3 : f32 to vector<2x384xf32>
    %20 = arith.maximumf %18, %19 : vector<2x384xf32>
    %21 = tpu.reciprocal %20 {approx = true} : vector<2x384xf32> -> vector<2x384xf32>
    %22 = arith.mulf %20, %21 : vector<2x384xf32>
    %cst_4 = arith.constant 2.000000e+00 : f32
    %23 = vector.broadcast %cst_4 : f32 to vector<2x384xf32>
    %24 = arith.subf %23, %22 : vector<2x384xf32>
    %25 = arith.mulf %21, %24 : vector<2x384xf32>
    %26 = math.absf %10 : vector<2x384xf32>
    %27 = arith.mulf %26, %25 : vector<2x384xf32>
    %28 = arith.addf %3, %27 : vector<2x384xf32>
    %c1_i32 = arith.constant 1 : i32
    %c0_5 = arith.constant 0 : index
    %c0_6 = arith.constant 0 : index
    %29 = vector.load %arg5[%c0_5, %c0_6] : memref<2x384xf32, #tpu.memory_space<vmem>>, vector<2x384xf32>
    %30 = arith.addf %29, %12 : vector<2x384xf32>
    %c0_7 = arith.constant 0 : index
    %c0_8 = arith.constant 0 : index
    %31 = vector.load %arg5[%c0_7, %c0_8] : memref<2x384xf32, #tpu.memory_space<vmem>>, vector<2x384xf32>
    tpu.vector_store %arg5[%c0_7, %c0_8], %30 {strides = array<i32>} : memref<2x384xf32, #tpu.memory_space<vmem>>, vector<2x384xf32>,
    %c0_9 = arith.constant 0 : index
    %c0_10 = arith.constant 0 : index
    %32 = vector.load %arg6[%c0_9, %c0_10] : memref<2x384xf32, #tpu.memory_space<vmem>>, vector<2x384xf32>
    %33 = arith.addf %32, %13 : vector<2x384xf32>
    %c0_11 = arith.constant 0 : index
    %c0_12 = arith.constant 0 : index
    %34 = vector.load %arg6[%c0_11, %c0_12] : memref<2x384xf32, #tpu.memory_space<vmem>>, vector<2x384xf32>
    tpu.vector_store %arg6[%c0_11, %c0_12], %33 {strides = array<i32>} : memref<2x384xf32, #tpu.memory_space<vmem>>, vector<2x384xf32>,
    %c0_13 = arith.constant 0 : index
    %c0_14 = arith.constant 0 : index
    %35 = vector.load %arg7[%c0_13, %c0_14] : memref<2x384xf32, #tpu.memory_space<vmem>>, vector<2x384xf32>
    %36 = arith.addf %35, %15 : vector<2x384xf32>
    %c0_15 = arith.constant 0 : index
    %c0_16 = arith.constant 0 : index
    %37 = vector.load %arg7[%c0_15, %c0_16] : memref<2x384xf32, #tpu.memory_space<vmem>>, vector<2x384xf32>
    tpu.vector_store %arg7[%c0_15, %c0_16], %36 {strides = array<i32>} : memref<2x384xf32, #tpu.memory_space<vmem>>, vector<2x384xf32>,
    %c0_17 = arith.constant 0 : index
    %c0_18 = arith.constant 0 : index
    %38 = vector.load %arg8[%c0_17, %c0_18] : memref<2x384xf32, #tpu.memory_space<vmem>>, vector<2x384xf32>
    %39 = arith.addf %38, %28 : vector<2x384xf32>
    %c0_19 = arith.constant 0 : index
    %c0_20 = arith.constant 0 : index
    %40 = vector.load %arg8[%c0_19, %c0_20] : memref<2x384xf32, #tpu.memory_space<vmem>>, vector<2x384xf32>
    tpu.vector_store %arg8[%c0_19, %c0_20], %39 {strides = array<i32>} : memref<2x384xf32, #tpu.memory_space<vmem>>, vector<2x384xf32>,
    %c0_i32_21 = arith.constant 0 : i32
    %41 = arith.cmpi eq, %arg1, %c0_i32_21 : i32
    %42 = arith.extui %41 : i1 to i32
    %c0_i32_22 = arith.constant 0 : i32
    %43 = arith.cmpi ne, %42, %c0_i32_22 : i32
    scf.if %43 {
      %c0_23 = arith.constant 0 : index
      %c0_24 = arith.constant 0 : index
      %44 = vector.load %arg5[%c0_23, %c0_24] : memref<2x384xf32, #tpu.memory_space<vmem>>, vector<2x384xf32>
      %45 = vector.shape_cast %44 : vector<2x384xf32> to vector<1x2x384xf32>
      %cst_25 = arith.constant dense<0.000000e+00> : vector<1xf32>
      %46 = vector.multi_reduction <add>, %45, %cst_25 [1, 2] : vector<1x2x384xf32> to vector<1xf32>
      %47 = vector.shape_cast %46 : vector<1xf32> to vector<1x1x1xf32>
      %48 = vector.extract %47[0, 0, 0] : f32 from vector<1x1x1xf32>
      %c0_26 = arith.constant 0 : index
      %c0_27 = arith.constant 0 : index
      %49 = vector.load %arg6[%c0_26, %c0_27] : memref<2x384xf32, #tpu.memory_space<vmem>>, vector<2x384xf32>
      %50 = vector.shape_cast %49 : vector<2x384xf32> to vector<1x2x384xf32>
      %cst_28 = arith.constant dense<0.000000e+00> : vector<1xf32>
      %51 = vector.multi_reduction <add>, %50, %cst_28 [1, 2] : vector<1x2x384xf32> to vector<1xf32>
      %52 = vector.shape_cast %51 : vector<1xf32> to vector<1x1x1xf32>
      %53 = vector.extract %52[0, 0, 0] : f32 from vector<1x1x1xf32>
      %c0_29 = arith.constant 0 : index
      %c0_30 = arith.constant 0 : index
      %54 = vector.load %arg7[%c0_29, %c0_30] : memref<2x384xf32, #tpu.memory_space<vmem>>, vector<2x384xf32>
      %55 = vector.shape_cast %54 : vector<2x384xf32> to vector<1x2x384xf32>
      %cst_31 = arith.constant dense<0.000000e+00> : vector<1xf32>
      %56 = vector.multi_reduction <add>, %55, %cst_31 [1, 2] : vector<1x2x384xf32> to vector<1xf32>
      %57 = vector.shape_cast %56 : vector<1xf32> to vector<1x1x1xf32>
      %58 = vector.extract %57[0, 0, 0] : f32 from vector<1x1x1xf32>
      %c0_32 = arith.constant 0 : index
      %c0_33 = arith.constant 0 : index
      %59 = vector.load %arg8[%c0_32, %c0_33] : memref<2x384xf32, #tpu.memory_space<vmem>>, vector<2x384xf32>
      %60 = vector.shape_cast %59 : vector<2x384xf32> to vector<1x2x384xf32>
      %cst_34 = arith.constant dense<0.000000e+00> : vector<1xf32>
      %61 = vector.multi_reduction <add>, %60, %cst_34 [1, 2] : vector<1x2x384xf32> to vector<1xf32>
      %62 = vector.shape_cast %61 : vector<1xf32> to vector<1x1x1xf32>
      %63 = vector.extract %62[0, 0, 0] : f32 from vector<1x1x1xf32>
      %64 = tpu.iota {dimensions = array<i32: 1>} : vector<8x128xi32>
      %c0_i32_35 = arith.constant 0 : i32
      %65 = vector.broadcast %c0_i32_35 : i32 to vector<8x128xi32>
      %66 = arith.cmpi eq, %64, %65 : vector<8x128xi32>
      %cst_36 = arith.constant 0.000000e+00 : f32
      %67 = vector.broadcast %48 : f32 to vector<8x128xf32>
      %68 = vector.broadcast %cst_36 : f32 to vector<8x128xf32>
      %69 = arith.select %66, %67, %68 : vector<8x128xi1>, vector<8x128xf32>
      %c1_i32_37 = arith.constant 1 : i32
      %70 = vector.broadcast %c1_i32_37 : i32 to vector<8x128xi32>
      %71 = arith.cmpi eq, %64, %70 : vector<8x128xi32>
      %cst_38 = arith.constant 0.000000e+00 : f32
      %72 = vector.broadcast %53 : f32 to vector<8x128xf32>
      %73 = vector.broadcast %cst_38 : f32 to vector<8x128xf32>
      %74 = arith.select %71, %72, %73 : vector<8x128xi1>, vector<8x128xf32>
      %75 = arith.addf %69, %74 : vector<8x128xf32>
      %c2_i32_39 = arith.constant 2 : i32
      %76 = vector.broadcast %c2_i32_39 : i32 to vector<8x128xi32>
      %77 = arith.cmpi eq, %64, %76 : vector<8x128xi32>
      %cst_40 = arith.constant 0.000000e+00 : f32
      %78 = vector.broadcast %58 : f32 to vector<8x128xf32>
      %79 = vector.broadcast %cst_40 : f32 to vector<8x128xf32>
      %80 = arith.select %77, %78, %79 : vector<8x128xi1>, vector<8x128xf32>
      %81 = arith.addf %75, %80 : vector<8x128xf32>
      %c3_i32 = arith.constant 3 : i32
      %82 = vector.broadcast %c3_i32 : i32 to vector<8x128xi32>
      %83 = arith.cmpi eq, %64, %82 : vector<8x128xi32>
      %cst_41 = arith.constant 0.000000e+00 : f32
      %84 = vector.broadcast %63 : f32 to vector<8x128xf32>
      %85 = vector.broadcast %cst_41 : f32 to vector<8x128xf32>
      %86 = arith.select %83, %84, %85 : vector<8x128xi1>, vector<8x128xf32>
      %87 = arith.addf %81, %86 : vector<8x128xf32>
      %c0_42 = arith.constant 0 : index
      %c0_43 = arith.constant 0 : index
      %88 = vector.load %arg4[%c0_42, %c0_43] : memref<8x128xf32, #tpu.memory_space<vmem>>, vector<8x128xf32>
      tpu.vector_store %arg4[%c0_42, %c0_43], %87 {strides = array<i32>} : memref<8x128xf32, #tpu.memory_space<vmem>>, vector<8x128xf32>,
    } else {
    }
    return
  }
  func.func @transform_0(%arg0: i32, %arg1: i32) -> (i32, i32) {
    %c1_i32 = arith.constant 1 : i32
    %0 = arith.muli %arg0, %c1_i32 : i32
    %1 = arith.addi %0, %arg1 : i32
    %c0_i32 = arith.constant 0 : i32
    %c0_i32_0 = arith.constant 0 : i32
    return %1, %c0_i32 : i32, i32
  }
  func.func @transform_1(%arg0: i32, %arg1: i32) -> (i32, i32) {
    %c1_i32 = arith.constant 1 : i32
    %0 = arith.muli %arg0, %c1_i32 : i32
    %1 = arith.addi %0, %arg1 : i32
    %c0_i32 = arith.constant 0 : i32
    %c0_i32_0 = arith.constant 0 : i32
    return %1, %c0_i32 : i32, i32
  }
  func.func @transform_2(%arg0: i32, %arg1: i32) -> (i32, i32) {
    %c0_i32 = arith.constant 0 : i32
    %c0_i32_0 = arith.constant 0 : i32
    return %arg0, %c0_i32 : i32, i32
  }
}

</mosaic_0001>

<bundles_post_ra>
// kernel: tpu_custom_call.1
= control target key start
LH: loop header
LB: loop body
LE: loop exit
PB: predicated region body
PF: predicated region fallthrough
CT: control target
= control target key end

     0   :  { %7 = vsyncpa [#allocation7], 0  ;;  %s434_s0 = inlined_call_operand.hbm [shape: f32[2,384], index: 0, kind: input, shape index: {}]   ;;  %s435_s1 = inlined_call_operand.hbm [shape: f32[2,384], index: 1, kind: input, shape index: {}]   ;;  %s436_s2 = inlined_call_operand.hbm [shape: f32[8,128], index: 2, kind: output, shape index: {}]  }
   0x1   :  { %8 = vsyncpa [#allocation10], 0 }
   0x2   :  { %9 = vsyncpa [#allocation8], 0  ;;  %s359_s9 = smov [#allocation6]   ;;  %s360_s11 = smov [#allocation9]  }
   0x3   :  { %s20_s10 = sshll.u32 %s359_s9, 4  ;;  %s34_s12 = sshll.u32 %s360_s11, 4  ;;  %s21_s10 = int_to_ptr.vmem [resolvable:$true] %s20_s10  ;;  %s35_s12 = int_to_ptr.vmem [resolvable:$true] %s34_s12 }
   0x4   :  { %s287_s15 = scalar_lea.hbm %s434_s0, 96 }
   0x5   :  { %p288_p0 = scmp.ne.s32.totalorder %s434_s0, %s287_s15  ;;  %p291_p1 = scmp.lt.u32.totalorder %s287_s15, %s434_s0 }
   0x7   :  { %p293_p2 = pnand %p291_p1, %p288_p0 }
   0x9   :  { %296 = shalt.err (!%p293_p2)
}
   0xa   :  { %s297_s20 = scalar_lea.vmem %s21_s10, 96  ;;  %p302_p4 = scmp.lt.s32.totalorder %s21_s10, %s21_s10 }
   0xb   :  { %p298_p3 = scmp.ne.s32.totalorder %s21_s10, %s297_s20  ;;  %p303_p5 = scmp.lt.s32.totalorder %s297_s20, %s297_s20 }
   0xd   :  { %p304_p6 = por %p303_p5, %p302_p4 }
   0xf   :  { %p305_p7 = pnand %p304_p6, %p298_p3 }
  0x11   :  { %308 = shalt.err (!%p305_p7)
}
  0x12   :  { %23 = dma.hbm_to_vmem [thread:$0]  %s434_s0, 96, %s21_s10, [#allocation7]  }
  0x13   :  { %s309_s25 = scalar_lea.hbm %s435_s1, 96 }
  0x14   :  { %p310_p8 = scmp.ne.s32.totalorder %s435_s1, %s309_s25  ;;  %p313_p9 = scmp.lt.u32.totalorder %s309_s25, %s435_s1 }
  0x16   :  { %p315_p10 = pnand %p313_p9, %p310_p8 }
  0x18   :  { %318 = shalt.err (!%p315_p10)
}
  0x19   :  { %s319_s30 = scalar_lea.vmem %s35_s12, 96  ;;  %p324_p12 = scmp.lt.s32.totalorder %s35_s12, %s35_s12 }
  0x1a   :  { %p320_p11 = scmp.ne.s32.totalorder %s35_s12, %s319_s30  ;;  %p325_p13 = scmp.lt.s32.totalorder %s319_s30, %s319_s30 }
  0x1c   :  { %p326_p0 = por %p325_p13, %p324_p12 }
  0x1e   :  { %p327_p1 = pnand %p326_p0, %p320_p11 }
  0x20   :  { %330 = shalt.err (!%p327_p1)
}
  0x21   :  { %37 = dma.hbm_to_vmem [thread:$0]  %s435_s1, 96, %s35_s12, [#allocation10]  }
  0x22   :  { %353 = dma.done.wait [#allocation7], 96  }
  0x23   :  { %354 = vsyncadd [#allocation7], 4294967200 }
  0x24   :  { %355 = dma.done.wait [#allocation10], 96  }
  0x25   :  { %356 = vsyncadd [#allocation10], 4294967200  ;;  %v361_v0 = vmov 0.0   ;;  %v57_v1 = vld [vmem:[#allocation6] sm:$0x3f]  ;;  %v99_v10 = vlaneseq  ;;  %vm114_vm0 = vcmask 1041408  }
  0x26   :  { %50 = vst [vmem:[#allocation2] sm:$0x3f] %v361_v0  ;;  %51 = vst [vmem:[#allocation3] sm:$0x3f] %v361_v0  ;;  %v60_v2 = vld [vmem:[#allocation9] sm:$0x3f]  ;;  %v65_v6 = vmul.f32 %v57_v1, %v57_v1 }
  0x27   :  { %52 = vst [vmem:[#allocation4] sm:$0x3f] %v361_v0  ;;  %53 = vst [vmem:[#allocation5] sm:$0x3f] %v361_v0  ;;  %v403_v3 = vsub.f32 %v60_v2, %v57_v1  ;;  %v67_v4 = vand.u32 2147483647, %v60_v2 }
  0x28   :  { %v68_v5 = vand.u32 2147483647, %v57_v1  ;;  %v362_v8 = vmov 1983009808   ;;  %v100_v20 = vshrl.u32 %v99_v10, 7  ;;  %s363_s7 = smov [#allocation11]  }
  0x29   :  { %v97_v9 = vunpack.c.l.s4 %v362_v8  ;;  %v62_v13 = vmul.f32 %v403_v3, %v403_v3  ;;  %v75_v53 = vand.u32 2147483647, %v403_v3  ;;  %s258_s8 = sshll.u32 %s363_s7, 4  ;;  %s259_s8 = int_to_ptr.vmem [resolvable:$true] %s258_s8 }
  0x2a   :  { %v69_v14 = vadd.f32 %v68_v5, %v67_v4  ;;  %s331_s9 = scalar_lea.vmem %s259_s8, 128  ;;  %p336_p3 = scmp.lt.s32.totalorder %s259_s8, %s259_s8 }
  0x2b   :  { %v98_v19 = vunpack.c.0.s8 %v97_v9  ;;  %p332_p2 = scmp.ne.s32.totalorder %s259_s8, %s331_s9  ;;  %p337_p4 = scmp.lt.s32.totalorder %s331_s9, %s331_s9 }
  0x2c   :  { %v70_v17 = vmax.f32 %v69_v14, 1.1754944e-38 }
  0x2d   :  { %v78_v7 = vld [vmem:[#allocation2] sm:$0x3f]  ;;  %v81_v11 = vld [vmem:[#allocation3] sm:$0x3f]  ;;  %v101_v21 = vsub.s32 %v98_v19, %v100_v20  ;;  %p338_p5 = por %p337_p4, %p336_p3 }
  0x2e   :  { %v84_v12 = vld [vmem:[#allocation4] sm:$0x3f]  ;;  %v82_v15 = vadd.f32 %v81_v11, %v57_v1  ;;  %v79_v18 = vadd.f32 %v78_v7, %v62_v13  ;;  %285 = vrcp.f32 %v70_v17  ;;  %v87_v57 = vld [vmem:[#allocation5] sm:$0x3f] }
  0x2f   :  { %v85_v16 = vadd.f32 %v84_v12, %v65_v6  ;;  %p339_p6 = pnand %p338_p5, %p332_p2 }
  0x30   :  { %83 = vst [vmem:[#allocation3] sm:$0x3f] %v82_v15  ;;  %80 = vst [vmem:[#allocation2] sm:$0x3f] %v79_v18 }
  0x31   :  { %86 = vst [vmem:[#allocation4] sm:$0x3f] %v85_v16 }
  0x37   :  { %v129_v22 = vld [vmem:[#allocation3] sm:$0x3f]  ;;  %v93_v28 = vld [vmem:[#allocation2] sm:$0x3f] }
  0x38   :  { %v164_v23 = vld [vmem:[#allocation4] sm:$0x3f]  ;;  %v131_v24 = vcombine.high %v129_v22, %v129_v22  ;;  %v138_v25 = vrot.slane %v129_v22, %v101_v21  ;;  %v95_v29 = vcombine.high %v93_v28, %v93_v28  ;;  %v102_v30 = vrot.slane %v93_v28, %v101_v21  ;;  %v286_v37 = vpop.eup %285 }
  0x39   :  { %v166_v26 = vcombine.high %v164_v23, %v164_v23  ;;  %v173_v27 = vrot.slane %v164_v23, %v101_v21  ;;  %v72_v47 = vmul.f32 %v286_v37, %v70_v17 }
  0x3a   :  { %v145_v31 = vrot.slane %v131_v24, %v101_v21  ;;  %v146_v32 = vcombine.high %v138_v25, %v138_v25  ;;  %v150_v33 = vsel %vm114_vm0, %v138_v25, 0.0  ;;  %v109_v38 = vrot.slane %v95_v29, %v101_v21 }
  0x3b   :  { %v180_v34 = vrot.slane %v166_v26, %v101_v21  ;;  %v181_v35 = vcombine.high %v173_v27, %v173_v27  ;;  %v185_v36 = vsel %vm114_vm0, %v173_v27, 0.0  ;;  %v110_v39 = vcombine.high %v102_v30, %v102_v30 }
  0x3c   :  { %v115_v40 = vsel %vm114_vm0, %v102_v30, 0.0  ;;  %v151_v41 = vsel %vm114_vm0, %v146_v32, 0.0  ;;  %v118_v45 = vsel %vm114_vm0, %v109_v38, 0.0  ;;  %v153_v50 = vsel %vm114_vm0, %v145_v31, 0.0 }
  0x3d   :  { %v186_v42 = vsel %vm114_vm0, %v181_v35, 0.0  ;;  %v188_v43 = vsel %vm114_vm0, %v180_v34, 0.0  ;;  %v116_v44 = vsel %vm114_vm0, %v110_v39, 0.0  ;;  %v152_v49 = vadd.f32 %v151_v41, %v150_v33 }
  0x3e   :  { %v187_v46 = vadd.f32 %v186_v42, %v185_v36  ;;  %v117_v48 = vadd.f32 %v116_v44, %v115_v40  ;;  %v73_v52 = vsub.f32 2.0, %v72_v47  ;;  %v235_v35 = vand.u32 127, %v99_v10 }
  0x3f   :  { %v154_v56 = vadd.f32 %v153_v50, %v152_v49 }
  0x40   :  { %v189_v51 = vadd.f32 %v188_v43, %v187_v46  ;;  %v119_v54 = vadd.f32 %v118_v45, %v117_v48  ;;  %v74_v55 = vmul.f32 %v286_v37, %v73_v52  ;;  %vm236_vm1 = vcmp.eq.s32.totalorder %v235_v35, 0 }
  0x41   :  { %vm239_vm2 = vcmp.eq.s32.totalorder %v235_v35, 1  ;;  %vm243_vm3 = vcmp.eq.s32.totalorder %v235_v35, 2  ;;  %vm247_vm4 = vcmp.eq.s32.totalorder %v235_v35, 3 }
  0x42   :  { %190 = vadd.xlane.f32.xlu1 %v189_v51  ;;  %120 = vadd.xlane.f32.xlu0 %v119_v54  ;;  %v76_v58 = vmul.f32 %v75_v53, %v74_v55 }
  0x44   :  { %v88_v59 = vadd.f32 %v87_v57, %v76_v58 }
  0x46   :  { %155 = vadd.xlane.f32.xlu0 %v154_v56  ;;  %89 = vst [vmem:[#allocation5] sm:$0x3f] %v88_v59 }
  0x4d   :  { %v199_v60 = vld [vmem:[#allocation5] sm:$0x3f] }
  0x4e   :  { %v201_v61 = vcombine.high %v199_v60, %v199_v60  ;;  %v208_v62 = vrot.slane %v199_v60, %v101_v21 }
  0x50   :  { %v215_v63 = vrot.slane %v201_v61, %v101_v21  ;;  %v216_v0 = vcombine.high %v208_v62, %v208_v62  ;;  %v220_v1 = vsel %vm114_vm0, %v208_v62, 0.0 }
  0x52   :  { %v221_v2 = vsel %vm114_vm0, %v216_v0, 0.0  ;;  %v223_v3 = vsel %vm114_vm0, %v215_v63, 0.0 }
  0x53   :  { %v222_v4 = vadd.f32 %v221_v2, %v220_v1 }
  0x55   :  { %v224_v5 = vadd.f32 %v223_v3, %v222_v4 }
  0x57   :  { %225 = vadd.xlane.f32.xlu1 %v224_v5 }
  0xcf   :  { %v191_v6 = vpop.xlane.xlu1 %190  ;;  %v121_v7 = vpop.xlane.xlu0 %120 }
  0xd0   :  { %v192_v8 = vrot.slane %v191_v6, 4  ;;  %v122_v9 = vrot.slane %v121_v7, 4 }
  0xd2   :  { %v193_v11 = vadd.f32 %v192_v8, %v191_v6  ;;  %v123_v12 = vadd.f32 %v122_v9, %v121_v7 }
  0xd3   :  { %v156_v13 = vpop.xlane.xlu0 %155 }
  0xd4   :  { %v194_v14 = vrot.slane %v193_v11, 2  ;;  %v124_v15 = vrot.slane %v123_v12, 2  ;;  %v157_v16 = vrot.slane %v156_v13, 4 }
  0xd6   :  { %v195_v17 = vadd.f32 %v194_v14, %v193_v11  ;;  %v158_v18 = vadd.f32 %v157_v16, %v156_v13  ;;  %v125_v19 = vadd.f32 %v124_v15, %v123_v12 }
  0xd8   :  { %v159_v20 = vrot.slane %v158_v18, 2  ;;  %v126_v21 = vrot.slane %v125_v19, 1  ;;  %v196_v22 = vrot.slane %v195_v17, 1 }
  0xda   :  { %v160_v23 = vadd.f32 %v159_v20, %v158_v18  ;;  %v127_v24 = vadd.f32 %v126_v21, %v125_v19  ;;  %v197_v26 = vadd.f32 %v196_v22, %v195_v17 }
  0xdc   :  { %268 = vpush %v127_v24  ;;  %v161_v25 = vrot.slane %v160_v23, 1 }
  0xde   :  { %v162_v27 = vadd.f32 %v161_v25, %v160_v23 }
  0xe0   :  { %270 = vpush %v162_v27 }
  0xe1   :  { %272 = vpush %v197_v26 }
  0xe4   :  { %v226_v28 = vpop.xlane.xlu1 %225 }
  0xe5   :  { %v227_v29 = vrot.slane %v226_v28, 4 }
  0xe7   :  { %v228_v30 = vadd.f32 %v227_v29, %v226_v28 }
  0xe9   :  { %v229_v31 = vrot.slane %v228_v30, 2 }
  0xeb   :  { %v230_v32 = vadd.f32 %v229_v31, %v228_v30 }
  0xed   :  { %v231_v33 = vrot.slane %v230_v32, 1 }
  0xef   :  { %v232_v34 = vadd.f32 %v231_v33, %v230_v32 }
  0xf1   :  { %274 = vpush %v232_v34 }
 0x10d   :  { %s269_s1 = spop %268 }
 0x10e   :  { %v237_v36 = vstv %s269_s1 }
 0x10f   :  { %v238_v38 = vsel %vm236_vm1, %v237_v36, 0.0 }
 0x111   :  { %s271_s4 = spop %270 }
 0x112   :  { %v240_v37 = vstv %s271_s4  ;;  %s273_s5 = spop %272 }
 0x113   :  { %v241_v39 = vsel %vm239_vm2, %v240_v37, 0.0  ;;  %v244_v40 = vstv %s273_s5 }
 0x114   :  { %v242_v41 = vadd.f32 %v241_v39, %v238_v38  ;;  %v245_v42 = vsel %vm243_vm3, %v244_v40, 0.0 }
 0x116   :  { %v246_v43 = vadd.f32 %v245_v42, %v242_v41 }
 0x122   :  { %s275_s6 = spop %274 }
 0x123   :  { %v248_v44 = vstv %s275_s6 }
 0x124   :  { %v249_v45 = vsel %vm247_vm4, %v248_v44, 0.0 }
 0x125   :  { %v250_v10 = vadd.f32 %v249_v45, %v246_v43 }
 0x127   :  { %251 = vst [vmem:[#allocation11] sm:$0xff] %v250_v10 }
 0x128   :  { %342 = shalt.err (!%p339_p6)
}
 0x129   :  { %s343_s12 = scalar_lea.hbm %s436_s2, 128 }
 0x12a   :  { %p344_p7 = scmp.ne.s32.totalorder %s436_s2, %s343_s12  ;;  %p347_p8 = scmp.lt.u32.totalorder %s343_s12, %s436_s2 }
 0x12c   :  { %p349_p9 = pnand %p347_p8, %p344_p7 }
 0x12e   :  { %352 = shalt.err (!%p349_p9)
}
 0x12f   :  { %261 = dma.vmem_to_hbm [thread:$0]  %s259_s8, 128, %s436_s2, [#allocation8]  }
 0x130   :  { %357 = dma.done.wait [#allocation8], 128  }
 0x131   :  { %358 = vsyncadd [#allocation8], 4294967168 }
 0x132   :  { %265 = vsyncpa [#allocation7], 1 }
 0x133   :  { %266 = vsyncpa [#allocation10], 1 }
 0x134   :  { %267 = vsyncpa [#allocation8], 1 }

</bundles_post_ra>
